<compile_context>
chip_gen: v5e
topology: v5e:2x2
jax: 0.10.0
libtpu: 0.0.40
codegen_flags: <defaults>
</compile_context>

<pallas_src>
import math

import jax
import jax.numpy as jnp
from jax.experimental import pallas as pl
from jax.experimental.pallas import tpu as pltpu


def make_positional_encoding(d_model: int, max_len: int = 5000) -> jnp.ndarray:
    """Reproduces the buffer built in PositionalEncoding.__init__ -> [max_len, d_model]."""
    # Same limitation as the PyTorch reference: the cos scatter requires even d_model.
    assert d_model % 2 == 0, "d_model must be even"
    position = jnp.arange(0, max_len, dtype=jnp.float32)[:, None]             # [max_len, 1]
    div_term = jnp.exp(
        jnp.arange(0, d_model, 2, dtype=jnp.float32) * (-math.log(10000.0) / d_model)
    )                                                                          # [d_model/2]
    angles = position * div_term                                               # [max_len, d_model/2]
    pe = jnp.zeros((max_len, d_model), dtype=jnp.float32)
    pe = pe.at[:, 0::2].set(jnp.sin(angles))
    pe = pe.at[:, 1::2].set(jnp.cos(angles))
    return pe


def _pe_add_kernel(x_ref, pe_ref, o_ref):
    # x_ref / o_ref: (ts, cols) tile of one batch element (batch dim squeezed out).
    # pe_ref: matching (ts, cols) tile, shared (and DMA-reused) across the batch axis.
    o_ref[...] = x_ref[...] + pe_ref[...]


def _lane_dense_factor(n: int, max_cols: int = 32768):
    """Largest multiple of 128 (<= max_cols) that divides n, or None if no such factor."""
    best = None
    c = 128
    while c <= min(n, max_cols):
        if n % c == 0:
            best = c
        c += 128
    return best


def _row_tile(rows: int, row_bytes: int, sub: int, target_block_bytes: int) -> int:
    """Row-tile size: a multiple of `sub` (sublane pack), ~target_block_bytes per block,
    keeping >= 2 row tiles when possible so v7x megacore can split the outer grid axis."""
    if rows <= sub:
        return rows  # full extent of the row axis; always a legal block dim
    ts = (target_block_bytes // max(row_bytes, 1)) // sub * sub
    ts = max(sub, min(ts, pl.cdiv(rows, sub) * sub))
    if pl.cdiv(rows, ts) < 2:
        ts = max(sub, pl.cdiv(pl.cdiv(rows, 2), sub) * sub)
    return ts


def positional_encoding_forward(x: jnp.ndarray, pe_full: jnp.ndarray,
                                *, target_block_bytes: int = 2 << 20) -> jnp.ndarray:
    """Forward: return x + pe[:x.shape[1]], x of shape [B, S, D]; pe_full is [max_len, D]."""
    B, S, D = x.shape
    max_len, d_pe = pe_full.shape
    if d_pe != D:
        raise ValueError(f"pe d_model ({d_pe}) does not match x d_model ({D})")
    if S > max_len:
        raise ValueError(f"sequence length {S} exceeds positional-encoding max_len {max_len}")
    if pe_full.dtype != x.dtype:
        # Fallback cast; prefer casting once at init (see __main__) to keep it off the hot path.
        pe_full = pe_full.astype(x.dtype)

    itemsize = jnp.dtype(x.dtype).itemsize
    sub = 16 if itemsize == 2 else 8  # sublane pack

    # Advisory cost: one add per element; x read + out write, pe read once (reused across B).
    cost = pl.CostEstimate(
        flops=B * S * D,
        transcendentals=0,
        bytes_accessed=2 * B * S * D * itemsize + S * D * itemsize,
    )
    compiler_params = pltpu.CompilerParams(
        dimension_semantics=("parallel", "parallel"),
        # 3 streams x 2 buffers x ~2 MiB blocks ~= 12 MiB; 32 MiB leaves headroom and fits
        # every generation (v5e default scoped limit is only 16 MiB, v7x physical is 64 MiB).
        vmem_limit_bytes=32 << 20,
    )

    if D % 128 == 0 and S >= sub:
        # Fast path: already lane-dense. No reshape and no per-call pe slice; the pe
        # BlockSpec selects row tiles straight out of the full (max_len, D) buffer.
        ts = _row_tile(S, D * itemsize, sub, target_block_bytes)
        grid = (pl.cdiv(S, ts), B)  # batch innermost -> pe tile DMA reused across B
        return pl.pallas_call(
            _pe_add_kernel,
            out_shape=jax.ShapeDtypeStruct((B, S, D), x.dtype),
            grid_spec=pltpu.PrefetchScalarGridSpec(
                num_scalar_prefetch=0,
                grid=grid,
                in_specs=[
                    pl.BlockSpec((None, ts, D), lambda s, b: (b, s, 0)),
                    pl.BlockSpec((ts, D), lambda s, b: (s, 0)),
                ],
                out_specs=pl.BlockSpec((None, ts, D), lambda s, b: (b, s, 0)),
            ),
            compiler_params=compiler_params,
            cost_estimate=cost,
        )(x, pe_full)

    # Fallback: present a lane-dense (rows, cols) view of the per-batch (S, D) slab so
    # stores are unmasked full-lane vst.  Row-major flattening keeps the elementwise
    # correspondence between x and pe exact.
    N = S * D
    cols = _lane_dense_factor(N)
    if cols is None:
        rows, cols = S, D  # masked-store fallback; last dim equals full extent (legal)
    else:
        rows = N // cols
    x2 = x.reshape(B, rows, cols)
    pe2 = pe_full[:S, :].reshape(rows, cols)  # slice only taken on this fallback path

    ts = _row_tile(rows, cols * itemsize, sub, target_block_bytes)
    grid = (pl.cdiv(rows, ts), B)  # batch innermost -> pe tile DMA reused across B
    out2 = pl.pallas_call(
        _pe_add_kernel,
        out_shape=jax.ShapeDtypeStruct((B, rows, cols), x.dtype),
        grid_spec=pltpu.PrefetchScalarGridSpec(
            num_scalar_prefetch=0,
            grid=grid,
            in_specs=[
                pl.BlockSpec((None, ts, cols), lambda s, b: (b, s, 0)),
                pl.BlockSpec((ts, cols), lambda s, b: (s, 0)),
            ],
            out_specs=pl.BlockSpec((None, ts, cols), lambda s, b: (b, s, 0)),
        ),
        compiler_params=compiler_params,
        cost_estimate=cost,
    )(x2, pe2)
    return out2.reshape(B, S, D)


if __name__ == "__main__":
    key = jax.random.PRNGKey(0)

    # --- Case 1: small shapes from the module's forward (exercises lane-dense reshape path).
    B, S, D = 2, 8, 32
    max_len = 64  # >= S; module default is 5000 but 64 keeps the example small
    x = jax.random.normal(key, (B, S, D), dtype=jnp.float32)
    # Init-time buffer: built once and cast once to the model dtype (kept off the hot path).
    pe_full = make_positional_encoding(D, max_len=max_len).astype(x.dtype)

    out = positional_encoding_forward(x, pe_full)
    out = jax.block_until_ready(out)
    ref = x + pe_full[None, :S, :]
    assert out.shape == (B, S, D)
    assert jnp.allclose(out, ref, atol=1e-6, rtol=1e-6)

    # --- Case 2: d_model a multiple of 128 (exercises the no-reshape fast path).
    B2, S2, D2 = 2, 16, 128
    x2 = jax.random.normal(jax.random.PRNGKey(1), (B2, S2, D2), dtype=jnp.float32)
    pe_full2 = make_positional_encoding(D2, max_len=max_len).astype(x2.dtype)
    out2 = positional_encoding_forward(x2, pe_full2)
    out2 = jax.block_until_ready(out2)
    ref2 = x2 + pe_full2[None, :S2, :]
    assert jnp.allclose(out2, ref2, atol=1e-6, rtol=1e-6)

    print("KERNEL_OK")
</pallas_src>

<mosaic_0001>
module attributes {stable_mosaic.version = 11 : i64} {
  func.func @_pe_add_kernel(%arg0: i32, %arg1: i32, %arg2: memref<1x1x256xf32, #tpu.memory_space<vmem>>, %arg3: memref<1x256xf32, #tpu.memory_space<vmem>>, %arg4: memref<1x1x256xf32, #tpu.memory_space<vmem>>) attributes {dimension_semantics = [#tpu.dimension_semantics<parallel>, #tpu.dimension_semantics<parallel>], iteration_bounds = array<i64: 1, 2>, scalar_prefetch = 0 : i64, scratch_operands = 0 : i64, tpu.core_type = #tpu.core_type<tc>, window_params = [{transform_indices = @transform_0, window_bounds = array<i64: 1, 1, 256>}, {transform_indices = @transform_1, window_bounds = array<i64: 1, 256>}, {transform_indices = @transform_2, window_bounds = array<i64: 1, 1, 256>}]} {
    %c0 = arith.constant 0 : index
    %c0_0 = arith.constant 0 : index
    %c0_1 = arith.constant 0 : index
    %0 = vector.load %arg2[%c0, %c0_0, %c0_1] : memref<1x1x256xf32, #tpu.memory_space<vmem>>, vector<1x1x256xf32>
    %1 = vector.shape_cast %0 : vector<1x1x256xf32> to vector<1x256xf32>
    %c0_2 = arith.constant 0 : index
    %c0_3 = arith.constant 0 : index
    %2 = vector.load %arg3[%c0_2, %c0_3] : memref<1x256xf32, #tpu.memory_space<vmem>>, vector<1x256xf32>
    %3 = arith.addf %1, %2 : vector<1x256xf32>
    %c0_4 = arith.constant 0 : index
    %c0_5 = arith.constant 0 : index
    %c0_6 = arith.constant 0 : index
    %4 = vector.load %arg4[%c0_4, %c0_5, %c0_6] : memref<1x1x256xf32, #tpu.memory_space<vmem>>, vector<1x1x256xf32>
    %5 = vector.shape_cast %4 : vector<1x1x256xf32> to vector<1x256xf32>
    %6 = vector.shape_cast %3 : vector<1x256xf32> to vector<1x1x256xf32>
    tpu.vector_store %arg4[%c0_4, %c0_5, %c0_6], %6 {strides = array<i32>} : memref<1x1x256xf32, #tpu.memory_space<vmem>>, vector<1x1x256xf32>,
    return
  }
  func.func @transform_0(%arg0: i32, %arg1: i32) -> (i32, i32, i32) {
    %c0_i32 = arith.constant 0 : i32
    %c0_i32_0 = arith.constant 0 : i32
    return %arg1, %arg0, %c0_i32 : i32, i32, i32
  }
  func.func @transform_1(%arg0: i32, %arg1: i32) -> (i32, i32) {
    %c0_i32 = arith.constant 0 : i32
    %c0_i32_0 = arith.constant 0 : i32
    return %arg0, %c0_i32 : i32, i32
  }
  func.func @transform_2(%arg0: i32, %arg1: i32) -> (i32, i32, i32) {
    %c0_i32 = arith.constant 0 : i32
    %c0_i32_0 = arith.constant 0 : i32
    return %arg1, %arg0, %c0_i32 : i32, i32, i32
  }
}

</mosaic_0001>

<bundles_post_ra>
// kernel: tpu_custom_call.1
= control target key start
LH: loop header
LB: loop body
LE: loop exit
PB: predicated region body
PF: predicated region fallthrough
CT: control target
= control target key end

     0   :  { %7 = vsyncpa [#allocation3], 0  ;;  %s722_s0 = inlined_call_operand.hbm [shape: f32[2,1,256], index: 0, kind: input, shape index: {}]   ;;  %s723_s1 = inlined_call_operand.hbm [shape: f32[1,256], index: 1, kind: input, shape index: {}]   ;;  %s724_s2 = inlined_call_operand.hbm [shape: f32[2,1,256], index: 2, kind: output, shape index: {}]  }
   0x1   :  { %9 = vsyncpa [#allocation3 + $0x1], 0 }
   0x2   :  { %10 = vsyncpa [#allocation6], 0 }
   0x3   :  { %11 = vsyncpa [#allocation4], 0 }
   0x4   :  { %13 = vsyncpa [#allocation4 + $0x1], 0  ;;  %s573_s9 = smov 0   ;;  %s575_s10 = smov 0  }
   0x5   :  { %s577_s11 = smov 0   ;;  %s579_s12 = smov 0  }
   0x6   :  { %s581_s13 = smov 0   ;;  %s583_s14 = smov 0  }
   0x7 LB: > { %s321_s15 = sadd.s32 4294967295, %s555_s14   ;;  %s322_s16 = sadd.s32 4294967294, %s555_s14   ;;  %s555_s14 = sphi %s583_s14, %s19_s14   ;;  %s551_s13 = sphi %s581_s13, %s736_s13   ;;  %s547_s12 = sphi %s579_s12, %s735_s12   ;;  %s543_s11 = sphi %s577_s11, %s734_s11   ;;  %s539_s10 = sphi %s575_s10, %s733_s10   ;;  %s535_s9 = sphi %s573_s9, %s732_s9  }
   0x8   : > { %p53_p0 = scmp.ne.s32.totalorder %s539_s10, %s535_s9  ;;  %p607_p1 = scmp.eq.s32.totalorder %s321_s15, 0 }
   0x9   : > { %p611_p2 = scmp.eq.s32.totalorder %s321_s15, 1  ;;  %p111_p3 = scmp.eq.s32.totalorder %s322_s16, 1 }
   0xa   : > { %p617_p4 = por %p607_p1, %p53_p0  ;;  %p323_p5 = scmp.ge.s32.totalorder %s555_s14, 1 }
   0xb   : > { %p622_p6 = por %p111_p3, %p53_p0  ;;  %p118_p7 = scmp.lt.s32.totalorder %s555_s14, 3 }
   0xc   : > { %s132_s23 = sshll.u32 %s723_s1, 4  ;;  %p325_p9 = scmp.ge.s32.totalorder %s555_s14, 2  ;;  %s133_s23 = int_to_ptr.hbm [resolvable:$true] %s132_s23 }
   0xd   : > { %p630_p8 = pnand %p323_p5, %p118_p7  ;;  %s557_s25 = smov [#allocation5]  }
   0xe   : > { %s134_s26 = sshll.u32 %s557_s25, 4  ;;  %s28_s27 = sadd.s32 1, %s551_s13  ;;  %s135_s26 = int_to_ptr.vmem [resolvable:$true] %s134_s26 }
   0xf   : > { %p344_p10 = pneg %p630_p8  ;;  %p29_p12 = scmp.ge.s32.totalorder %s28_s27, 2 }
  0x10   : > { %s40_s28 = sadd.s32 1, %s543_s11  ;;  %p47_p13 = scmp.ne.s32.totalorder %s543_s11, %s539_s10 }
  0x11   : > { %p345_p11 = pnand %p344_p10, %p607_p1  ;;  %p48_p0 = scmp.eq.s32.totalorder %s555_s14, 0 }
  0x12   : > { %s738_s27 = smov (%p29_p12, %s28_s27), 0  ;;  %p652_p5 = por %p611_p2, %p47_p13 }
  0x13   : > { %347 = dma.hbm_to_vmem [thread:$0]  (!%p345_p11), %s133_s23, 32, %s135_s26, [#allocation6]  }
  0x14   : > { %p646_p3 = por %p48_p0, %p47_p13  ;;  %s35_s3 = ssub.s32 %s551_s13, %s738_s27 }
  0x15   : > { %p357_p7 = scmp.lt.s32.totalorder %s555_s14, 2  ;;  %p38_p10 = scmp.eq.s32.totalorder %s35_s3, 0 }
  0x16   : > { %s145_s4 = sand.u32 1, %s543_s11   ;;  %s327_s7 = sshll.u32 %s551_s13, 1 }
  0x17   : > { %s326_s5 = sshll.u32 %s145_s4, 1  ;;  %s155_s16 = scalar_lea.hbm %s722_s0, %s327_s7 }
  0x18   : > { %s661_s6 = scalar_select %p38_p10, %s543_s11, %s40_s28  }
  0x19   : > { %s149_s21 = scalar_lea.vmem [#allocation2], %s326_s5  ;;  %s157_s18 = sshll.u32 %s155_s16, 4  ;;  %s158_s18 = int_to_ptr.hbm [resolvable:$true] %s157_s18 }
  0x1a   : > { %s159_s22 = sshll.u32 %s149_s21, 4  ;;  %p349_p2 = pnand %p357_p7, %p646_p3  ;;  %s160_s22 = int_to_ptr.vmem [resolvable:$true] %s159_s22 }
  0x1b   : > { %s146_s23 = scalar_lea.sflag [#allocation3], %s145_s4  ;;  %168 = sbr.rel (%p630_p8) target bundleno = 50 (0x32), region = 28 }
  0x1c   : > { %351 = dma.hbm_to_vmem [thread:$0]  (!%p349_p2), %s158_s18, 32, %s160_s22, %s146_s23  }
  0x1d   : > { %s672_s25 = sand.u32 (!%p630_p8), 1, %s539_s10  }
  0x1e   : > { %s329_s26 = sshll.u32 (!%p630_p8), %s672_s25, 1  ;;  %s171_s28 = scalar_lea.sflag (!%p630_p8), [#allocation3], %s672_s25 }
  0x1f   : > { %s174_s3 = scalar_lea.vmem (!%p630_p8), [#allocation2], %s329_s26 }
  0x20   : > { %522 = dma.done.wait (%p617_p4), %s171_s28, 32  }
  0x21   : > { %524 = vsyncadd (%p617_p4), %s171_s28, 4294967264 }
  0x22   : > { %526 = dma.done.wait (%p607_p1), [#allocation6], 32  }
  0x23   : > { %528 = vsyncadd (%p607_p1), [#allocation6], 4294967264  ;;  %s333_s24 = sshll.u32 %s547_s12, 1  ;;  %v204_v0 = vlaneseq  ;;  %s200_s7 = scalar_lea.vmem [#allocation7], %s329_s26  ;;  %v201_v1 = vld [vmem:[%s174_s3] sm:$0x3] }
  0x24   : > { %s222_s5 = scalar_lea.hbm %s724_s2, %s333_s24  ;;  %s224_s8 = sshll.u32 %s200_s7, 4  ;;  %v202_v2 = vld [vmem:[#allocation5] sm:$0x3]  ;;  %s225_s8 = int_to_ptr.vmem [resolvable:$true] %s224_s8 }
  0x25   : > { %s226_s15 = sshll.u32 %s222_s5, 4  ;;  %vm206_vm0 = vcmp.lt.s32.totalorder %v204_v0, 256  ;;  %v203_v3 = vadd.f32 %v202_v2, %v201_v1  ;;  %s210_s17 = scalar_lea.sflag [#allocation4], %s672_s25  ;;  %s227_s15 = int_to_ptr.hbm [resolvable:$true] %s226_s15 }
  0x26   : > { %s483_s19 = sshra.s32 %s227_s15, 4  ;;  %s489_s22 = scalar_lea.hbm %s724_s2, 4  ;;  %s484_s19 = int_to_ptr.hbm [resolvable:$true] %s483_s19 }
  0x27   : > { %208 = vst.msk [vmem:[%s200_s7] sm:$0x3] %vm206_vm0, %v203_v3  ;;  %s485_s12 = scalar_lea.hbm %s484_s19, 2  ;;  %p490_p11 = scmp.lt.s32.totalorder %s484_s19, %s724_s2 }
  0x28   : > { %p486_p1 = scmp.ne.s32.totalorder %s484_s19, %s485_s12  ;;  %p491_p12 = scmp.lt.s32.totalorder %s489_s22, %s485_s12 }
  0x2a   : > { %p487_p4 = pnand %p486_p1, %p652_p5  ;;  %p492_p13 = por %p491_p12, %p490_p11 }
  0x2c   : > { %p488_p8 = pneg %p487_p4 }
  0x2e   : > { %p493_p0 = pnand %p492_p13, %p488_p8 }
  0x30   : > { %496 = shalt.err (!%p493_p0)
}
  0x31   : > { %342 = dma.vmem_to_hbm [thread:$0]  (%p652_p5), %s225_s8, 32, %s227_s15, %s210_s17  }
  0x32 PF: > { %s238_s25 = sand.u32 1, %s535_s9   ;;  %p353_p3 = pnand %p325_p9, %p622_p6 }
  0x33   : > { %s239_s26 = scalar_lea.sflag [#allocation4], %s238_s25 }
  0x34   : > { %p354_p7 = pneg %p353_p3 }
  0x36   : > { %530 = dma.done.wait (%p354_p7), %s239_s26, 32  }
  0x37   : > { %532 = vsyncadd (%p354_p7), %s239_s26, 4294967264  ;;  %s19_s14 = sadd.s32 1, %s555_s14   ;;  %s732_s9 = smov %s539_s10 }
  0x38   : > { %p16_p10 = scmp.ge.s32.totalorder %s19_s14, 4   ;;  %s733_s10 = smov %s543_s11 }
  0x39   : > { %s734_s11 = smov %s661_s6  ;;  %s735_s12 = smov %s551_s13 }
  0x3a   : > { %s736_s13 = smov %s738_s27  ;;  %18 = sbr.rel (!%p16_p10) target bundleno = 7 (0x7), region = 78 }
  0x3f   :  { %245 = vsyncpa [#allocation3], 1 }
  0x40   :  { %247 = vsyncpa [#allocation3 + $0x1], 1 }
  0x41   :  { %248 = vsyncpa [#allocation6], 1 }
  0x42   :  { %249 = vsyncpa [#allocation4], 1 }
  0x43   :  { %251 = vsyncpa [#allocation4 + $0x1], 1 }

</bundles_post_ra>
